<compile_context>
chip_gen: v7x
topology: tpu7x:2x2x1
jax: 0.10.0
libtpu: 0.0.40
codegen_flags: <defaults>
</compile_context>

<pallas_src>
import math
import functools

import jax
import jax.numpy as jnp
from jax import lax
from jax.experimental import pallas as pl
from jax.experimental.pallas import tpu as pltpu

_NEG_LOGIT = -1e30  # bias sentinel for padded feature columns (exp underflows to 0)


def _round_up(x, m):
    return ((x + m - 1) // m) * m


def decoder_d_kernel(x_ref, w_ref, b_ref, o_ref):
    # ReLU in f32, then feed the MXU with bf16 operands / f32 accumulation.
    x = jnp.maximum(x_ref[...], 0.0).astype(jnp.bfloat16)
    # Plain (K, N) contraction against the pre-transposed (in_dim, d_pad) weight:
    # (TB, K) . (K, d_pad) -> (TB, d_pad).  No per-step relayout of the weight.
    y = lax.dot_general(
        x, w_ref[...],
        dimension_numbers=(((1,), (0,)), ((), ())),
        preferred_element_type=jnp.float32,
    ) + b_ref[...]
    # Numerically-stable log_softmax over the full feature row (PyTorch dim=1).
    # Padded columns carry a -1e30 bias so they never win the max and exp -> 0.
    m = jnp.max(y, axis=-1, keepdims=True)
    z = y - m
    lse = jnp.log(jnp.sum(jnp.exp(z), axis=-1, keepdims=True))
    o_ref[...] = (z - lse).astype(o_ref.dtype)


def prepare_decoder_d_params(weight, bias):
    """One-time param prep (call once, reuse across forward calls).

    weight: (d_dim, in_dim) f32 (native nn.Linear layout); bias: (d_dim,) f32.
    Returns:
      w_t : (in_dim, d_pad) bf16, pre-transposed so the kernel does a plain
            (K, N) MXU contraction with no per-step relayout.
      b   : (1, d_pad) f32, padded columns set to a -1e30 sentinel.

    Correctness note: the bf16 weight cast deviates slightly from a pure-f32
    nn.Linear; keep the weight in f32 here if strict parity is required."""
    d_dim, in_dim = weight.shape
    d_pad = _round_up(d_dim, 128)
    w_t = jnp.zeros((in_dim, d_pad), jnp.bfloat16)
    w_t = w_t.at[:, :d_dim].set(weight.T.astype(jnp.bfloat16))
    b = jnp.full((1, d_pad), _NEG_LOGIT, jnp.float32)
    b = b.at[0, :d_dim].set(bias.astype(jnp.float32))
    return w_t, b


def _vmem_info():
    """(physical VMEM bytes, tile budget bytes) -- conservative if unknown."""
    cap_phys = 64 << 20  # assume v7x (smallest VMEM) if the query fails
    try:
        info_cap = int(pltpu.get_tpu_info().vmem_capacity_bytes)
        if info_cap > 0:
            cap_phys = info_cap
    except Exception:
        pass
    # Leave roughly half of physical VMEM as compiler headroom; never budget
    # more than 48 MiB for this kernel's working set.
    budget = min(cap_phys // 2, 48 << 20)
    return cap_phys, budget


def _choose_tb(B, in_dim, d_pad, vmem_budget):
    """Batch-tile rows per grid step, budgeted against VMEM."""
    # Per-row VMEM bytes in the pipeline: x (2 f32 buffers), out (2 f32 buffers)
    # and ~3x f32 softmax temporaries along the wide d_pad axis.
    per_row = 2 * in_dim * 4 + 2 * d_pad * 4 + 3 * d_pad * 4
    w_bytes = in_dim * d_pad * 2  # bf16 weight, single-buffered (grid-invariant)
    cap = max(8, (vmem_budget - w_bytes) // max(per_row, 1))
    tb_max = 512 if vmem_budget >= (48 << 20) else 256  # v5e/v6e vs v7x
    tb = max(8, (min(tb_max, cap) // 8) * 8)
    if B <= tb:
        # Small/medium batch: keep >= 2 grid steps when possible so the
        # "parallel" batch axis can shard across both v7x TensorCores.
        if B >= 16:
            tb = _round_up(pl.cdiv(B, 2), 8)
        else:
            tb = _round_up(max(B, 1), 8)
    elif tb >= 128:
        tb = (tb // 128) * 128  # keep large tiles 128-aligned for the MXU
    return tb


@functools.partial(jax.jit, static_argnames=("d_dim",))
def decoder_d_forward(x, w_t, b_pad, *, d_dim):
    """x: (B, in_dim) f32; w_t: (in_dim, d_pad) bf16; b_pad: (1, d_pad) f32."""
    B, in_dim = x.shape
    d_pad = w_t.shape[1]

    cap_phys, budget = _vmem_info()
    tb = _choose_tb(B, in_dim, d_pad, budget)
    grid = (pl.cdiv(B, tb),)  # ragged last tile handled by Pallas edge masking

    # Explicit VMEM budget: single-buffered weight + double-buffered x/out
    # windows + f32 softmax temporaries + headroom (defaults are only 16/32 MiB).
    vmem_limit = (in_dim * d_pad * 2            # bf16 weight, 1 buffer
                  + d_pad * 4                   # bias, 1 buffer
                  + 2 * tb * in_dim * 4         # x, 2 buffers
                  + 2 * tb * d_pad * 4          # out, 2 buffers
                  + 4 * tb * d_pad * 4          # f32 y / exp / z temporaries
                  + (8 << 20))                  # headroom
    vmem_limit = int(min(max(vmem_limit, 32 << 20),
                         max(cap_phys - (8 << 20), 32 << 20)))

    cost = pl.CostEstimate(
        flops=2 * B * in_dim * d_pad,
        transcendentals=2 * B * d_pad,  # exp + log
        bytes_accessed=(x.size * 4 + w_t.size * 2 + b_pad.size * 4
                        + B * d_pad * 4),
    )

    out = pl.pallas_call(
        decoder_d_kernel,
        out_shape=jax.ShapeDtypeStruct((B, d_pad), jnp.float32),
        grid_spec=pl.GridSpec(
            grid=grid,
            in_specs=[
                # x streams over the batch (double-buffered by default).
                pl.BlockSpec((tb, in_dim), lambda i: (i, 0)),
                # Grid-invariant weight / bias: single-buffered (saves VMEM).
                pl.BlockSpec((in_dim, d_pad), lambda i: (0, 0),
                             pipeline_mode=pl.Buffered(1)),
                pl.BlockSpec((1, d_pad), lambda i: (0, 0),
                             pipeline_mode=pl.Buffered(1)),
            ],
            out_specs=pl.BlockSpec((tb, d_pad), lambda i: (i, 0)),
        ),
        compiler_params=pltpu.CompilerParams(
            dimension_semantics=("parallel",),
            vmem_limit_bytes=vmem_limit,
        ),
        cost_estimate=cost,
    )(x, w_t, b_pad)

    # Drop the padded feature columns.
    return out[:, :d_dim]


def init_params(key, in_dim, d_dim):
    """Deterministic init matching nn.Linear's default (kaiming-uniform style)."""
    k_w, k_b = jax.random.split(key)
    limit = 1.0 / math.sqrt(in_dim)
    weight = jax.random.uniform(k_w, (d_dim, in_dim), jnp.float32, -limit, limit)
    bias = jax.random.uniform(k_b, (d_dim,), jnp.float32, -limit, limit)
    return weight, bias


if __name__ == "__main__":
    key = jax.random.PRNGKey(0)
    k_x, k_p = jax.random.split(key)

    batch, in_dim, d_dim = 8, 32, 16
    x = jax.random.normal(k_x, (batch, in_dim), jnp.float32)
    weight, bias = init_params(k_p, in_dim, d_dim)

    w_t, b_pad = prepare_decoder_d_params(weight, bias)
    out = decoder_d_forward(x, w_t, b_pad, d_dim=d_dim)
    out = jax.block_until_ready(out)

    # Reference 1: same bf16 MXU feed / f32 accumulation as the kernel (tight).
    xr = jnp.maximum(x, 0.0).astype(jnp.bfloat16)
    y_bf = lax.dot_general(
        xr, weight.astype(jnp.bfloat16),
        dimension_numbers=(((1,), (1,)), ((), ())),
        preferred_element_type=jnp.float32,
    ) + bias
    ref_bf16 = jax.nn.log_softmax(y_bf, axis=1)

    # Reference 2: pure-f32 PyTorch-style forward (loose, covers bf16 feed).
    y_f32 = jnp.maximum(x, 0.0) @ weight.T + bias
    ref_f32 = jax.nn.log_softmax(y_f32, axis=1)

    assert out.shape == (batch, d_dim)
    assert jnp.allclose(out, ref_bf16, atol=1e-4, rtol=1e-4), \
        float(jnp.max(jnp.abs(out - ref_bf16)))
    assert jnp.allclose(out, ref_f32, atol=1e-1), \
        float(jnp.max(jnp.abs(out - ref_f32)))

    print("KERNEL_OK")
</pallas_src>

<mosaic_0001>
module attributes {stable_mosaic.version = 11 : i64} {
  func.func @decoder_d_kernel(%arg0: i32, %arg1: memref<8x32xf32, #tpu.memory_space<vmem>>, %arg2: memref<32x128xbf16, #tpu.memory_space<vmem>>, %arg3: memref<1x128xf32, #tpu.memory_space<vmem>>, %arg4: memref<8x128xf32, #tpu.memory_space<vmem>>) attributes {dimension_semantics = [#tpu.dimension_semantics<parallel>], iteration_bounds = array<i64: 1>, scalar_prefetch = 0 : i64, scratch_operands = 0 : i64, tpu.core_type = #tpu.core_type<tc>, window_params = [{transform_indices = @transform_0, window_bounds = array<i64: 8, 32>}, {pipeline_mode = #tpu.pipeline_mode<synchronous>, transform_indices = @transform_1, window_bounds = array<i64: 32, 128>}, {pipeline_mode = #tpu.pipeline_mode<synchronous>, transform_indices = @transform_2, window_bounds = array<i64: 1, 128>}, {transform_indices = @transform_3, window_bounds = array<i64: 8, 128>}]} {
    %c0 = arith.constant 0 : index
    %c0_0 = arith.constant 0 : index
    %0 = vector.load %arg1[%c0, %c0_0] : memref<8x32xf32, #tpu.memory_space<vmem>>, vector<8x32xf32>
    %cst = arith.constant 0.000000e+00 : f32
    %1 = vector.broadcast %cst : f32 to vector<8x32xf32>
    %2 = arith.maximumf %0, %1 : vector<8x32xf32>
    %3 = arith.truncf %2 : vector<8x32xf32> to vector<8x32xbf16>
    %c0_1 = arith.constant 0 : index
    %c0_2 = arith.constant 0 : index
    %4 = vector.load %arg2[%c0_1, %c0_2] : memref<32x128xbf16, #tpu.memory_space<vmem>>, vector<32x128xbf16>
    %cst_3 = arith.constant dense<0.000000e+00> : vector<8x128xf32>
    %5 = tpu.matmul %3, %4, %cst_3 {dimension_numbers = #tpu.dot_dimension_numbers<[1], [0], [0], [1], [0, 0, 1, 1], [], []>} : vector<8x32xbf16>, vector<32x128xbf16>, vector<8x128xf32> -> vector<8x128xf32>
    %c0_4 = arith.constant 0 : index
    %c0_5 = arith.constant 0 : index
    %6 = vector.load %arg3[%c0_4, %c0_5] : memref<1x128xf32, #tpu.memory_space<vmem>>, vector<1x128xf32>
    %7 = vector.broadcast %6 : vector<1x128xf32> to vector<8x128xf32>
    %8 = arith.addf %5, %7 : vector<8x128xf32>
    %cst_6 = arith.constant dense<0xFF800000> : vector<8xf32>
    %9 = vector.multi_reduction <maximumf>, %8, %cst_6 [1] : vector<8x128xf32> to vector<8xf32>
    %10 = vector.shape_cast %9 : vector<8xf32> to vector<8x1xf32>
    %11 = vector.broadcast %10 : vector<8x1xf32> to vector<8x128xf32>
    %12 = arith.subf %8, %11 : vector<8x128xf32>
    %13 = math.exp %12 : vector<8x128xf32>
    %cst_7 = arith.constant dense<0.000000e+00> : vector<8xf32>
    %14 = vector.multi_reduction <add>, %13, %cst_7 [1] : vector<8x128xf32> to vector<8xf32>
    %15 = vector.shape_cast %14 : vector<8xf32> to vector<8x1xf32>
    %16 = math.log %15 : vector<8x1xf32>
    %17 = vector.broadcast %16 : vector<8x1xf32> to vector<8x128xf32>
    %18 = arith.subf %12, %17 : vector<8x128xf32>
    %c0_8 = arith.constant 0 : index
    %c0_9 = arith.constant 0 : index
    %19 = vector.load %arg4[%c0_8, %c0_9] : memref<8x128xf32, #tpu.memory_space<vmem>>, vector<8x128xf32>
    tpu.vector_store %arg4[%c0_8, %c0_9], %18 {strides = array<i32>} : memref<8x128xf32, #tpu.memory_space<vmem>>, vector<8x128xf32>,
    return
  }
  func.func @transform_0(%arg0: i32) -> (i32, i32) {
    %c0_i32 = arith.constant 0 : i32
    %c0_i32_0 = arith.constant 0 : i32
    return %arg0, %c0_i32 : i32, i32
  }
  func.func @transform_1(%arg0: i32) -> (i32, i32) {
    %c0_i32 = arith.constant 0 : i32
    %c0_i32_0 = arith.constant 0 : i32
    %c0_i32_1 = arith.constant 0 : i32
    return %c0_i32, %c0_i32_0 : i32, i32
  }
  func.func @transform_2(%arg0: i32) -> (i32, i32) {
    %c0_i32 = arith.constant 0 : i32
    %c0_i32_0 = arith.constant 0 : i32
    %c0_i32_1 = arith.constant 0 : i32
    return %c0_i32, %c0_i32_0 : i32, i32
  }
  func.func @transform_3(%arg0: i32) -> (i32, i32) {
    %c0_i32 = arith.constant 0 : i32
    %c0_i32_0 = arith.constant 0 : i32
    return %arg0, %c0_i32 : i32, i32
  }
}

</mosaic_0001>

<bundles_post_ra>
// kernel: decoder_d_forward.1
= control target key start
LH: loop header
LB: loop body
LE: loop exit
PB: predicated region body
PF: predicated region fallthrough
CT: control target
= control target key end

     0   :  { %8 = vsyncpa [#allocation3], 0  ;;  %s312_s0 = inlined_call_operand.hbm [shape: f32[8,32], index: 0, kind: input, shape index: {}]   ;;  %s313_s1 = inlined_call_operand.hbm [shape: bf16[32,128], index: 1, kind: input, shape index: {}]   ;;  %s314_s2 = inlined_call_operand.vmem [shape: f32[1,128], index: 2, kind: input, shape index: {}]   ;;  %s315_s3 = inlined_call_operand.hbm [shape: f32[8,128], index: 3, kind: output, shape index: {}]  }
   0x1   :  { %9 = vsyncpa [#allocation6], 0 }
   0x2   :  { %10 = vsyncpa [#allocation4], 0  ;;  %s239_s12 = smov [#allocation2]   ;;  %s240_s14 = smov [#allocation5]  }
   0x3   :  { %s17_s13 = sshll.u32 %s239_s12, 4  ;;  %s26_s15 = sshll.u32 %s240_s14, 4  ;;  %s18_s13 = int_to_ptr.vmem [resolvable:$true] %s17_s13  ;;  %s266_s15 = int_to_ptr.vmem [resolvable:$true] %s26_s15 }
   0x4   :  { %s167_s18 = scalar_lea.hbm %s312_s0, 128 }
   0x5   :  { %p168_p0 = scmp.ne.s32.totalorder %s312_s0, %s167_s18  ;;  %p171_p1 = scmp.lt.u32.totalorder %s167_s18, %s312_s0 }
   0x7   :  { %p173_p2 = pnand %p171_p1, %p168_p0 }
   0x9   :  { %176 = shalt.err (!%p173_p2)
}
   0xa   :  { %s177_s23 = scalar_lea.vmem %s18_s13, 128  ;;  %p182_p4 = scmp.lt.s32.totalorder %s18_s13, %s18_s13 }
   0xb   :  { %p178_p3 = scmp.ne.s32.totalorder %s18_s13, %s177_s23  ;;  %p183_p5 = scmp.lt.s32.totalorder %s177_s23, %s177_s23 }
   0xd   :  { %p184_p6 = por %p183_p5, %p182_p4 }
   0xf   :  { %p185_p7 = pnand %p184_p6, %p178_p3 }
  0x11   :  { %188 = shalt.err (!%p185_p7)
}
  0x12   :  { %20 = dma.hbm_to_vmem [thread:$0]  %s312_s0, 128, %s18_s13, [#allocation3]  }
  0x13   :  { %s189_s28 = scalar_lea.hbm %s313_s1, 256 }
  0x14   :  { %p190_p8 = scmp.ne.s32.totalorder %s313_s1, %s189_s28  ;;  %p193_p9 = scmp.lt.u32.totalorder %s189_s28, %s313_s1 }
  0x16   :  { %p195_p10 = pnand %p193_p9, %p190_p8 }
  0x18   :  { %198 = shalt.err (!%p195_p10)
}
  0x19   :  { %s199_s6 = scalar_lea.vmem %s266_s15, 256  ;;  %p204_p12 = scmp.lt.s32.totalorder %s266_s15, %s266_s15 }
  0x1a   :  { %p200_p11 = scmp.ne.s32.totalorder %s266_s15, %s199_s6  ;;  %p205_p13 = scmp.lt.s32.totalorder %s199_s6, %s199_s6 }
  0x1c   :  { %p206_p0 = por %p205_p13, %p204_p12 }
  0x1e   :  { %p207_p1 = pnand %p206_p0, %p200_p11 }
  0x20   :  { %210 = shalt.err (!%p207_p1)
}
  0x21   :  { %s241_s0 = smov 64   ;;  %s242_s7 = smov 4  }
  0x22   :  { %32 = dma.hbm_to_vmem [thread:$0]  %s313_s1, 256, %s266_s15, [#allocation6], %s241_s0, %s241_s0, %s242_s7  }
  0x23   :  { %233 = dma.done.wait [#allocation3], 128  }
  0x24   :  { %234 = vsyncadd [#allocation3], 4294967168 }
  0x25   :  { %235 = dma.done.wait [#allocation6], 256  }
  0x26   :  { %236 = vsyncadd [#allocation6], 4294967040  ;;  %v243_v0 = vmov 0.0   ;;  %vm244_vm0 = vmmov 0   ;;  %v161_v1 = vld [vmem:[#allocation5] sm:$0xff]   ;;  %v162_v2 = vld [vmem:[#allocation5 + $0x8] sm:$0xff]  }
  0x27   :  { %146 = vmatprep.subr.bf16.mxu0 %v243_v0  ;;  %150 = vmatprep.mubr.msk.bf16.mxu0 %vm244_vm0, %v243_v0  ;;  %v42_v3 = vld [vmem:[#allocation2] sm:$0xff]  ;;  %vm68_vm1 = vcmask 261120   ;;  %s245_s11 = smov [#allocation7]  }
  0x28   :  { %147 = vmatpush3.bf16.msra.mxu0 %v161_v1  ;;  %v43_v4 = vmax.f32 %v42_v3, 0.0  ;;  %v139_v6 = vld [vmem:[%s314_s2] ss:$0 sm:$0xff]  ;;  %s129_s12 = sshll.u32 %s245_s11, 4  ;;  %s130_s12 = int_to_ptr.vmem [resolvable:$true] %s129_s12 }
  0x29   :  { %148 = vmatprep.subr.bf16.mxu0 %v243_v0  ;;  %s211_s2 = scalar_lea.vmem %s130_s12, 128  ;;  %p216_p3 = scmp.lt.s32.totalorder %s130_s12, %s130_s12 }
  0x2a   :  { %v44_v5 = vpack.c.bf16 %v43_v4, %v43_v4  ;;  %p212_p2 = scmp.ne.s32.totalorder %s130_s12, %s211_s2  ;;  %p217_p4 = scmp.lt.s32.totalorder %s211_s2, %s211_s2 }
  0x2c   :  { %149 = vmatpush3.bf16.msra.mxu0 %v162_v2  ;;  %p218_p5 = por %p217_p4, %p216_p3 }
  0x2e   :  { %p219_p6 = pnand %p218_p5, %p212_p2 }
  0x2f   :  { %151 = vmatmul.mubr.msk.bf16.vlgmr.msra.gmra.mrb[0].mxu0 %vm68_vm1, %v44_v5 }
 0x102   :  { %v106_v7 = vpop.f32.mrb[0].mxu0 }
 0x103   :  { %v107_v8 = vadd.f32 %v139_v6, %v106_v7  ;;  %v152_v9 = vpop.f32.mrb[1].mxu0 }
 0x104   :  { %v109_v10 = vpop.f32.mrb[2].mxu0 }
 0x105   :  { %112 = vmax.xlane.f32.xlu0 %v107_v8  ;;  %v153_v11 = vpop.f32.mrb[3].mxu0 }
 0x192   :  { %v113_v12 = vpop.xlane.xlu0 %112 }
 0x193   :  { %v114_v13 = vsub.f32 %v107_v8, %v113_v12 }
 0x195   :  { %v115_v14 = vmul.f32 1.442695, %v114_v13 }
 0x197   :  { %163 = vpow2.f32 %v115_v14 }
 0x1a1   :  { %v164_v15 = vpop.eup %163 }
 0x1a2   :  { %117 = vadd.xlane.f32.xlu0 %v164_v15 }
 0x22f   :  { %v118_v16 = vpop.xlane.xlu0 %117 }
 0x230   :  { %165 = vlog2.f32 %v118_v16 }
 0x23a   :  { %v166_v17 = vpop.eup %165 }
 0x23b   :  { %v120_v18 = vmul.f32 0.6931472, %v166_v17 }
 0x23d   :  { %v121_v19 = vsub.f32 %v114_v13, %v120_v18 }
 0x23f   :  { %122 = vst [vmem:[#allocation7] sm:$0xff] %v121_v19 }
 0x240   :  { %222 = shalt.err (!%p219_p6)
}
 0x241   :  { %s223_s15 = scalar_lea.hbm %s315_s3, 128 }
 0x242   :  { %p224_p7 = scmp.ne.s32.totalorder %s315_s3, %s223_s15  ;;  %p227_p8 = scmp.lt.u32.totalorder %s223_s15, %s315_s3 }
 0x244   :  { %p229_p9 = pnand %p227_p8, %p224_p7 }
 0x246   :  { %232 = shalt.err (!%p229_p9)
}
 0x247   :  { %132 = dma.vmem_to_hbm [thread:$0]  %s130_s12, 128, %s315_s3, [#allocation4]  }
 0x248   :  { %237 = dma.done.wait [#allocation4], 128  }
 0x249   :  { %238 = vsyncadd [#allocation4], 4294967168 }
 0x24a   :  { %136 = vsyncpa [#allocation3], 1 }
 0x24b   :  { %137 = vsyncpa [#allocation6], 1 }
 0x24c   :  { %138 = vsyncpa [#allocation4], 1 }

</bundles_post_ra>
